<compile_context>
chip_gen: v7x
topology: tpu7x:2x2x1
jax: 0.10.0
libtpu: 0.0.40
codegen_flags: <defaults>
</compile_context>

<pallas_src>
import functools

import jax
import jax.numpy as jnp
from jax.experimental import pallas as pl
from jax.experimental.pallas import tpu as pltpu


_PAR1 = pltpu.CompilerParams(dimension_semantics=("parallel",))


# ---------------------------------------------------------------------------
# helpers
# ---------------------------------------------------------------------------

def _row_tile(m, max_t=512):
    """Large row tile that divides m exactly; prefer >=2 grid steps when cheap."""
    if m > max_t:
        for t in range(max_t, 7, -8):
            if m % t == 0:
                return t
        return m
    if m >= 256 and (m // 2) % 8 == 0:
        return m // 2          # >= 2 grid steps keeps both v7x TensorCores busy
    return m


def _erf(x):
    # Abramowitz & Stegun 7.1.26 (max abs err ~1.5e-7): matches torch's exact-erf
    # GELU to f32 precision and only needs exp (EUP slot).
    a1, a2, a3, a4, a5 = 0.254829592, -0.284496736, 1.421413741, -1.453152027, 1.061405429
    p = 0.3275911
    s = jnp.sign(x)
    z = jnp.abs(x)
    t = 1.0 / (1.0 + p * z)
    poly = ((((a5 * t + a4) * t + a3) * t + a2) * t + a1) * t
    return s * (1.0 - poly * jnp.exp(-z * z))


def _gelu(x):
    return 0.5 * x * (1.0 + _erf(x * 0.7071067811865476))


def _ln(x, g, b, eps):
    mu = jnp.mean(x, axis=-1, keepdims=True)
    xc = x - mu
    var = jnp.mean(xc * xc, axis=-1, keepdims=True)
    return xc * jax.lax.rsqrt(var + eps) * g + b


# ---------------------------------------------------------------------------
# Pallas kernels
# ---------------------------------------------------------------------------

def _linear_kernel(*refs, gelu, ln_pre_eps, ln_post_eps, has_res):
    """[LN_pre ->] x @ w + b [-> GELU] [-> LN_post] [+ residual]."""
    it = iter(refs)
    x_ref = next(it)
    if ln_pre_eps is not None:
        gpre_ref, bpre_ref = next(it), next(it)
    w_ref, b_ref = next(it), next(it)
    if ln_post_eps is not None:
        gpost_ref, bpost_ref = next(it), next(it)
    if has_res:
        r_ref = next(it)
    o_ref = next(it)

    x = x_ref[...]
    if ln_pre_eps is not None:
        x = _ln(x, gpre_ref[...], bpre_ref[...], ln_pre_eps)
    # MXU operands in bf16, accumulation in f32
    y = jnp.dot(x.astype(jnp.bfloat16), w_ref[...],
                preferred_element_type=jnp.float32) + b_ref[...]
    if gelu:
        y = _gelu(y)
    if ln_post_eps is not None:
        y = _ln(y, gpost_ref[...], bpost_ref[...], ln_post_eps)
    if has_res:
        y = y + r_ref[...]
    o_ref[...] = y


def fused_linear(x, w, b, *, ln_pre=None, ln_post=None, gelu=False, residual=None):
    """One pallas_call for a Linear with its fused neighbours.

    ln_pre / ln_post are (gamma, beta, eps) tuples; BatchNorm must be pre-folded
    into (w, b) on the host; `w` is stored bf16.
    """
    m, k = x.shape
    n = w.shape[1]
    tm = _row_tile(m)
    assert m % tm == 0, (m, tm)

    args = [x]
    specs = [pl.BlockSpec((tm, k), lambda i: (i, 0))]
    if ln_pre is not None:
        g, bb, _ = ln_pre
        args += [g.reshape(1, k), bb.reshape(1, k)]
        specs += [pl.BlockSpec((1, k), lambda i: (0, 0)),
                  pl.BlockSpec((1, k), lambda i: (0, 0))]
    args += [w, b.reshape(1, n)]
    specs += [pl.BlockSpec((k, n), lambda i: (0, 0)),
              pl.BlockSpec((1, n), lambda i: (0, 0))]
    if ln_post is not None:
        g2, b2, _ = ln_post
        args += [g2.reshape(1, n), b2.reshape(1, n)]
        specs += [pl.BlockSpec((1, n), lambda i: (0, 0)),
                  pl.BlockSpec((1, n), lambda i: (0, 0))]
    if residual is not None:
        args += [residual]
        specs += [pl.BlockSpec((tm, n), lambda i: (i, 0))]

    kern = functools.partial(
        _linear_kernel, gelu=gelu,
        ln_pre_eps=None if ln_pre is None else ln_pre[2],
        ln_post_eps=None if ln_post is None else ln_post[2],
        has_res=residual is not None)
    return pl.pallas_call(
        kern,
        out_shape=jax.ShapeDtypeStruct((m, n), jnp.float32),
        grid=(m // tm,),
        in_specs=specs,
        out_specs=pl.BlockSpec((tm, n), lambda i: (i, 0)),
        compiler_params=_PAR1,
    )(*args)


def _layernorm_kernel(x_ref, g_ref, b_ref, o_ref, *, eps):
    o_ref[...] = _ln(x_ref[...], g_ref[...], b_ref[...], eps)


def layernorm(x, g, b, eps):
    m, c = x.shape
    tm = _row_tile(m)
    assert m % tm == 0, (m, tm)
    return pl.pallas_call(
        functools.partial(_layernorm_kernel, eps=eps),
        out_shape=jax.ShapeDtypeStruct((m, c), jnp.float32),
        grid=(m // tm,),
        in_specs=[pl.BlockSpec((tm, c), lambda i: (i, 0)),
                  pl.BlockSpec((1, c), lambda i: (0, 0)),
                  pl.BlockSpec((1, c), lambda i: (0, 0))],
        out_specs=pl.BlockSpec((tm, c), lambda i: (i, 0)),
        compiler_params=_PAR1,
    )(x, g.reshape(1, c), b.reshape(1, c))


def _dwconv_kernel(x_ref, w_ref, b_ref, o_ref, *, residual):
    # x_ref: (H+2, W+2, C) zero-padded image (batch squeezed); w_ref: (9, C);
    # b_ref: (1, 1, C).  The 9 shifted windows are sliced directly out of VMEM —
    # no im2col materialization in HBM.
    h, wdt, _ = o_ref.shape
    w = w_ref[...]
    acc = x_ref[0:h, 0:wdt, :] * w[0]
    for kh in range(3):
        for kw in range(3):
            if kh == 0 and kw == 0:
                continue
            acc = acc + x_ref[kh:kh + h, kw:kw + wdt, :] * w[3 * kh + kw]
    acc = acc + b_ref[...]
    if residual:
        acc = acc + x_ref[1:1 + h, 1:1 + wdt, :]     # fused PosCNN residual
    o_ref[...] = acc


def dwconv3x3(x, w9, b, *, residual=False):
    """Depthwise 3x3, stride 1, padding 1, NHWC; optional fused residual add."""
    bsz, h, wdt, c = x.shape
    xp = jnp.pad(x, ((0, 0), (1, 1), (1, 1), (0, 0)))
    return pl.pallas_call(
        functools.partial(_dwconv_kernel, residual=residual),
        out_shape=jax.ShapeDtypeStruct((bsz, h, wdt, c), jnp.float32),
        grid=(bsz,),
        in_specs=[pl.BlockSpec((None, h + 2, wdt + 2, c), lambda i: (i, 0, 0, 0)),
                  pl.BlockSpec((9, c), lambda i: (0, 0)),
                  pl.BlockSpec((1, 1, c), lambda i: (0, 0, 0))],
        out_specs=pl.BlockSpec((None, h, wdt, c), lambda i: (i, 0, 0, 0)),
        compiler_params=_PAR1,
    )(xp, w9, b.reshape(1, 1, c))


def _attn_kernel(q_ref, k_ref, v_ref, o_ref, *, scale):
    # All heads of one batch element per grid step: (heads, nq/nk, d) blocks.
    q = q_ref[...].astype(jnp.bfloat16)
    k = k_ref[...].astype(jnp.bfloat16)
    v = v_ref[...].astype(jnp.bfloat16)
    s = jnp.einsum('hqd,hkd->hqk', q, k,
                   preferred_element_type=jnp.float32) * scale
    s = s - jnp.max(s, axis=-1, keepdims=True)
    p = jnp.exp(s)
    l = jnp.sum(p, axis=-1, keepdims=True)
    o = jnp.einsum('hqk,hkd->hqd', p.astype(jnp.bfloat16), v,
                   preferred_element_type=jnp.float32)
    # fold the softmax denominator into the (nq, d) output; reciprocal -> EUP slot
    o_ref[...] = o * pl.reciprocal(l, approx=True)


def fused_attention(q, k, v, scale):
    bsz, heads, nq, d = q.shape
    nk = k.shape[2]
    return pl.pallas_call(
        functools.partial(_attn_kernel, scale=scale),
        out_shape=jax.ShapeDtypeStruct((bsz, heads, nq, d), jnp.float32),
        grid=(bsz,),
        in_specs=[pl.BlockSpec((None, heads, nq, d), lambda i: (i, 0, 0, 0)),
                  pl.BlockSpec((None, heads, nk, d), lambda i: (i, 0, 0, 0)),
                  pl.BlockSpec((None, heads, nk, d), lambda i: (i, 0, 0, 0))],
        out_specs=pl.BlockSpec((None, heads, nq, d), lambda i: (i, 0, 0, 0)),
        compiler_params=_PAR1,
    )(q, k, v)


# ---------------------------------------------------------------------------
# model pieces built on the kernels (glue: reshapes / padding / param routing)
# ---------------------------------------------------------------------------

def sepconv2d(p, x_img, stride, *, gelu=False):
    # SepConv2d: depthwise 3x3 -> BatchNorm2d(eval, folded into pointwise) -> 1x1.
    # stride 2 == stride-1 depthwise output subsampled at even positions (exact).
    y = dwconv3x3(x_img, p['dw_w'], p['dw_b'])
    if stride == 2:
        y = y[:, ::2, ::2, :]
    bsz, ho, wo, cin = y.shape
    out = fused_linear(y.reshape(bsz * ho * wo, cin), p['pw_w'], p['pw_b'], gelu=gelu)
    return out.reshape(bsz, ho, wo, -1)


def attention_forward(p, y_ln, t_res, bsz, h, w, dim, heads):
    x_img = y_ln.reshape(bsz, h, w, dim)
    q = sepconv2d(p['to_q'], x_img, 1)
    k = sepconv2d(p['to_k'], x_img, 2)
    v = sepconv2d(p['to_v'], x_img, 2)
    d = dim // heads

    def heads_first(z):
        b_, ho, wo, _ = z.shape
        return z.reshape(b_, ho * wo, heads, d).transpose(0, 2, 1, 3)

    o = fused_attention(heads_first(q), heads_first(k), heads_first(v),
                        float(d) ** -0.5)
    nq = h * w
    o = o.transpose(0, 2, 1, 3).reshape(bsz * nq, dim)
    # output projection with the outer residual add fused in
    return fused_linear(o, p['proj_w'], p['proj_b'], residual=t_res)


def leff_forward(p, t, pn_g, pn_b, bsz, h, w, dim):
    sdim = p['up_w'].shape[1]
    # PreNorm LN + up_proj Linear + BN1d(folded) + GELU  -> one kernel
    y = fused_linear(t, p['up_w'], p['up_b'], ln_pre=(pn_g, pn_b, 1e-5), gelu=True)
    # depth_conv: SepConv2d (inner BN folded) + outer BN2d (folded) + GELU
    y = sepconv2d(p['sep'], y.reshape(bsz, h, w, sdim), 1, gelu=True)
    # down_proj Linear + BN1d(folded) + GELU, with the outer residual fused in
    return fused_linear(y.reshape(bsz * h * w, sdim), p['down_w'], p['down_b'],
                        gelu=True, residual=t)


def block_forward(p, t, bsz, h, w, dim, heads):
    # x = x + Attention(LN_1e-6(x));  x = x + LeFF(LN_1e-5(x))
    y = layernorm(t, p['n1_g'], p['n1_b'], 1e-6)
    t = attention_forward(p['attn'], y, t, bsz, h, w, dim, heads)
    t = leff_forward(p['leff'], t, p['pn_g'], p['pn_b'], bsz, h, w, dim)
    return t


def peg_forward(p, t, bsz, h, w, dim):
    # PosCNN: depthwise 3x3 conv + residual, fused in one kernel
    y = dwconv3x3(t.reshape(bsz, h, w, dim), p['w'], p['b'], residual=True)
    return y.reshape(bsz * h * w, dim)


def patch_embed_forward(p, x, ps):
    # Dense conv with kernel==stride==patch_size -> matmul over patch vectors,
    # with the LayerNorm fused as an epilogue (use_depth=False in the reference).
    bsz, h, w, cin = x.shape
    hn, wn = h // ps, w // ps
    xcol = (x.reshape(bsz, hn, ps, wn, ps, cin)
             .transpose(0, 1, 3, 2, 4, 5)
             .reshape(bsz * hn * wn, ps * ps * cin))
    t = fused_linear(xcol, p['w'], p['b'], ln_post=(p['ln_g'], p['ln_b'], 1e-5))
    return t, hn, wn, p['w'].shape[1]


def mlvit_forward(params, x_nchw):
    x = jnp.transpose(x_nchw, (0, 2, 3, 1)).astype(jnp.float32)   # NCHW -> NHWC
    outs = []
    n_stages = len(params['stages'])
    for si, sp in enumerate(params['stages']):
        bsz = x.shape[0]
        t, hn, wn, e = patch_embed_forward(sp['patch'], x, sp['patch_size'])
        for bi, bp in enumerate(sp['blocks']):
            t = block_forward(bp, t, bsz, hn, wn, e, sp['num_heads'])
            if bi == 0:
                t = peg_forward(sp['peg'], t, bsz, hn, wn, e)
        if si == n_stages - 1:
            t = layernorm(t, params['final_ln_g'], params['final_ln_b'], 1e-6)
        x = t.reshape(bsz, hn, wn, e)
        outs.append(jnp.transpose(x, (0, 3, 1, 2)))                # stage output NCHW
    return outs


# ---------------------------------------------------------------------------
# deterministic synthetic parameters (with host-side BN folding + bf16 weights)
# ---------------------------------------------------------------------------

def init_params(seed, in_chans, patch_size, embed_dims, num_heads, mlp_ratios, depths):
    key = jax.random.PRNGKey(seed)

    def nk():
        nonlocal key
        key, k = jax.random.split(key)
        return k

    def rnd(shape, std):
        return (std * jax.random.normal(nk(), shape)).astype(jnp.float32)

    def bn(c, eps=1e-5):
        # eval-mode BatchNorm reduces to a per-channel affine (scale, shift)
        gamma = 1.0 + rnd((c,), 0.1)
        beta = rnd((c,), 0.05)
        mean = rnd((c,), 0.05)
        var = jnp.abs(1.0 + rnd((c,), 0.1))
        scale = gamma / jnp.sqrt(var + eps)
        shift = beta - mean * scale
        return scale.astype(jnp.float32), shift.astype(jnp.float32)

    def fold_in(w, b, s, t):    # BN before the matmul: (x*s + t) @ w + b
        return s[:, None] * w, t @ w + b

    def fold_out(w, b, s, t):   # BN after the matmul: (x @ w + b)*s + t
        return w * s[None, :], b * s + t

    def as_w(w):                # matmul weights are stored bf16 (MXU operands)
        return w.astype(jnp.bfloat16)

    def sepconv(cin, cout, out_bn=None):
        # depthwise weights stay f32 (VPU path); inner BN (and optional outer BN)
        # are folded into the pointwise 1x1 weights.
        pw_w, pw_b = fold_in(rnd((cin, cout), 0.05), rnd((cout,), 0.02), *bn(cin))
        if out_bn is not None:
            pw_w, pw_b = fold_out(pw_w, pw_b, *out_bn)
        return dict(dw_w=rnd((9, cin), 0.1), dw_b=rnd((cin,), 0.02),
                    pw_w=as_w(pw_w), pw_b=pw_b)

    stages = []
    cur_c = in_chans
    for s in range(4):
        e = embed_dims[s]
        ps = patch_size if s == 0 else 2
        # the reference constructor builds every PatchEmbed with use_depth=False
        patch = dict(w=as_w(rnd((ps * ps * cur_c, e), 0.05)), b=rnd((e,), 0.02),
                     ln_g=jnp.ones((e,), jnp.float32),
                     ln_b=jnp.zeros((e,), jnp.float32))
        sdim = e * mlp_ratios[s]
        blocks = []
        for _ in range(depths[s]):
            attn = dict(to_q=sepconv(e, e), to_k=sepconv(e, e), to_v=sepconv(e, e),
                        proj_w=as_w(rnd((e, e), 0.02)), proj_b=rnd((e,), 0.02))
            up_w, up_b = fold_out(rnd((e, sdim), 0.02), rnd((sdim,), 0.02), *bn(sdim))
            dn_w, dn_b = fold_out(rnd((sdim, e), 0.02), rnd((e,), 0.02), *bn(e))
            leff = dict(up_w=as_w(up_w), up_b=up_b,
                        sep=sepconv(sdim, sdim, out_bn=bn(sdim)),
                        down_w=as_w(dn_w), down_b=dn_b)
            blocks.append(dict(n1_g=jnp.ones((e,), jnp.float32),
                               n1_b=jnp.zeros((e,), jnp.float32),
                               pn_g=jnp.ones((e,), jnp.float32),
                               pn_b=jnp.zeros((e,), jnp.float32),
                               attn=attn, leff=leff))
        stages.append(dict(patch=patch, patch_size=ps, num_heads=num_heads[s],
                           peg=dict(w=rnd((9, e), 0.1), b=rnd((e,), 0.02)),
                           blocks=blocks))
        cur_c = e
    return dict(stages=stages,
                final_ln_g=jnp.ones((embed_dims[-1],), jnp.float32),
                final_ln_b=jnp.zeros((embed_dims[-1],), jnp.float32))


# ---------------------------------------------------------------------------
# demo
# ---------------------------------------------------------------------------

if __name__ == "__main__":
    B, C_IN, IMG, PATCH = 2, 3, 32, 2
    embed_dims = [16, 32, 64, 128]
    num_heads = [1, 2, 4, 8]
    mlp_ratios = [8, 8, 4, 4]
    depths = [1, 1, 1, 1]   # shallow demo config (original default: [3, 4, 6, 3])

    params = init_params(0, C_IN, PATCH, embed_dims, num_heads, mlp_ratios, depths)
    x = jax.random.normal(jax.random.PRNGKey(0), (B, C_IN, IMG, IMG), jnp.float32)

    outs = mlvit_forward(params, x)
    outs = jax.block_until_ready(outs)

    expected_hw = [IMG // 2, IMG // 4, IMG // 8, IMG // 16]
    for o, e, hw in zip(outs, embed_dims, expected_hw):
        assert o.shape == (B, e, hw, hw), o.shape
        assert bool(jnp.all(jnp.isfinite(o)))
    print("KERNEL_OK")
</pallas_src>

<mosaic_0001>
module attributes {stable_mosaic.version = 11 : i64} {
  func.func @_linear_kernel(%arg0: i32, %arg1: memref<256x12xf32, #tpu.memory_space<vmem>>, %arg2: memref<12x16xbf16, #tpu.memory_space<vmem>>, %arg3: memref<1x16xf32, #tpu.memory_space<vmem>>, %arg4: memref<1x16xf32, #tpu.memory_space<vmem>>, %arg5: memref<1x16xf32, #tpu.memory_space<vmem>>, %arg6: memref<256x16xf32, #tpu.memory_space<vmem>>) attributes {dimension_semantics = [#tpu.dimension_semantics<parallel>], iteration_bounds = array<i64: 2>, scalar_prefetch = 0 : i64, scratch_operands = 0 : i64, tpu.core_type = #tpu.core_type<tc>, window_params = [{transform_indices = @transform_0, window_bounds = array<i64: 256, 12>}, {pipeline_mode = #tpu.pipeline_mode<synchronous>, transform_indices = @transform_1, window_bounds = array<i64: 12, 16>}, {pipeline_mode = #tpu.pipeline_mode<synchronous>, transform_indices = @transform_2, window_bounds = array<i64: 1, 16>}, {pipeline_mode = #tpu.pipeline_mode<synchronous>, transform_indices = @transform_3, window_bounds = array<i64: 1, 16>}, {pipeline_mode = #tpu.pipeline_mode<synchronous>, transform_indices = @transform_4, window_bounds = array<i64: 1, 16>}, {transform_indices = @transform_5, window_bounds = array<i64: 256, 16>}]} {
    %c0 = arith.constant 0 : index
    %c0_0 = arith.constant 0 : index
    %0 = vector.load %arg1[%c0, %c0_0] : memref<256x12xf32, #tpu.memory_space<vmem>>, vector<256x12xf32>
    %1 = arith.truncf %0 : vector<256x12xf32> to vector<256x12xbf16>
    %c0_1 = arith.constant 0 : index
    %c0_2 = arith.constant 0 : index
    %2 = vector.load %arg2[%c0_1, %c0_2] : memref<12x16xbf16, #tpu.memory_space<vmem>>, vector<12x16xbf16>
    %cst = arith.constant dense<0.000000e+00> : vector<256x16xf32>
    %3 = tpu.matmul %1, %2, %cst {dimension_numbers = #tpu.dot_dimension_numbers<[1], [0], [0], [1], [0, 0, 1, 1], [], []>} : vector<256x12xbf16>, vector<12x16xbf16>, vector<256x16xf32> -> vector<256x16xf32>
    %c0_3 = arith.constant 0 : index
    %c0_4 = arith.constant 0 : index
    %4 = vector.load %arg3[%c0_3, %c0_4] : memref<1x16xf32, #tpu.memory_space<vmem>>, vector<1x16xf32>
    %5 = vector.broadcast %4 : vector<1x16xf32> to vector<256x16xf32>
    %6 = arith.addf %3, %5 : vector<256x16xf32>
    %c0_5 = arith.constant 0 : index
    %c0_6 = arith.constant 0 : index
    %7 = vector.load %arg4[%c0_5, %c0_6] : memref<1x16xf32, #tpu.memory_space<vmem>>, vector<1x16xf32>
    %c0_7 = arith.constant 0 : index
    %c0_8 = arith.constant 0 : index
    %8 = vector.load %arg5[%c0_7, %c0_8] : memref<1x16xf32, #tpu.memory_space<vmem>>, vector<1x16xf32>
    %cst_9 = arith.constant dense<0.000000e+00> : vector<256xf32>
    %9 = vector.multi_reduction <add>, %6, %cst_9 [1] : vector<256x16xf32> to vector<256xf32>
    %10 = vector.shape_cast %9 : vector<256xf32> to vector<256x1xf32>
    %cst_10 = arith.constant 1.600000e+01 : f32
    %11 = vector.broadcast %cst_10 : f32 to vector<256x1xf32>
    %12 = arith.divf %10, %11 : vector<256x1xf32>
    %13 = vector.broadcast %12 : vector<256x1xf32> to vector<256x16xf32>
    %14 = arith.subf %6, %13 : vector<256x16xf32>
    %15 = arith.mulf %14, %14 : vector<256x16xf32>
    %cst_11 = arith.constant dense<0.000000e+00> : vector<256xf32>
    %16 = vector.multi_reduction <add>, %15, %cst_11 [1] : vector<256x16xf32> to vector<256xf32>
    %17 = vector.shape_cast %16 : vector<256xf32> to vector<256x1xf32>
    %cst_12 = arith.constant 1.600000e+01 : f32
    %18 = vector.broadcast %cst_12 : f32 to vector<256x1xf32>
    %19 = arith.divf %17, %18 : vector<256x1xf32>
    %cst_13 = arith.constant 9.99999974E-6 : f32
    %20 = vector.broadcast %cst_13 : f32 to vector<256x1xf32>
    %21 = arith.addf %19, %20 : vector<256x1xf32>
    %22 = math.rsqrt %21 : vector<256x1xf32>
    %23 = vector.broadcast %22 : vector<256x1xf32> to vector<256x16xf32>
    %24 = arith.mulf %14, %23 : vector<256x16xf32>
    %25 = vector.broadcast %7 : vector<1x16xf32> to vector<256x16xf32>
    %26 = arith.mulf %24, %25 : vector<256x16xf32>
    %27 = vector.broadcast %8 : vector<1x16xf32> to vector<256x16xf32>
    %28 = arith.addf %26, %27 : vector<256x16xf32>
    %c0_14 = arith.constant 0 : index
    %c0_15 = arith.constant 0 : index
    %29 = vector.load %arg6[%c0_14, %c0_15] : memref<256x16xf32, #tpu.memory_space<vmem>>, vector<256x16xf32>
    tpu.vector_store %arg6[%c0_14, %c0_15], %28 {strides = array<i32>} : memref<256x16xf32, #tpu.memory_space<vmem>>, vector<256x16xf32>,
    return
  }
  func.func @transform_0(%arg0: i32) -> (i32, i32) {
    %c0_i32 = arith.constant 0 : i32
    %c0_i32_0 = arith.constant 0 : i32
    return %arg0, %c0_i32 : i32, i32
  }
  func.func @transform_1(%arg0: i32) -> (i32, i32) {
    %c0_i32 = arith.constant 0 : i32
    %c0_i32_0 = arith.constant 0 : i32
    %c0_i32_1 = arith.constant 0 : i32
    return %c0_i32, %c0_i32_0 : i32, i32
  }
  func.func @transform_2(%arg0: i32) -> (i32, i32) {
    %c0_i32 = arith.constant 0 : i32
    %c0_i32_0 = arith.constant 0 : i32
    %c0_i32_1 = arith.constant 0 : i32
    return %c0_i32, %c0_i32_0 : i32, i32
  }
  func.func @transform_3(%arg0: i32) -> (i32, i32) {
    %c0_i32 = arith.constant 0 : i32
    %c0_i32_0 = arith.constant 0 : i32
    %c0_i32_1 = arith.constant 0 : i32
    return %c0_i32, %c0_i32_0 : i32, i32
  }
  func.func @transform_4(%arg0: i32) -> (i32, i32) {
    %c0_i32 = arith.constant 0 : i32
    %c0_i32_0 = arith.constant 0 : i32
    %c0_i32_1 = arith.constant 0 : i32
    return %c0_i32, %c0_i32_0 : i32, i32
  }
  func.func @transform_5(%arg0: i32) -> (i32, i32) {
    %c0_i32 = arith.constant 0 : i32
    %c0_i32_0 = arith.constant 0 : i32
    return %arg0, %c0_i32 : i32, i32
  }
}

</mosaic_0001>

<bundles_post_ra>
// kernel: tpu_custom_call.1
= control target key start
LH: loop header
LB: loop body
LE: loop exit
PB: predicated region body
PF: predicated region fallthrough
CT: control target
= control target key end

     0   :  { %s1286_s18 = smov 0   ;;  %s1892_s0 = inlined_call_operand.vmem [shape: f32[512,12], index: 0, kind: input, shape index: {}]   ;;  %s1893_s1 = inlined_call_operand.vmem [shape: bf16[12,16], index: 1, kind: input, shape index: {}]   ;;  %s1894_s2 = inlined_call_operand.vmem [shape: f32[1,16], index: 2, kind: input, shape index: {}]   ;;  %s1895_s3 = inlined_call_operand.vmem [shape: f32[1,16], index: 3, kind: input, shape index: {}]   ;;  %s1896_s4 = inlined_call_operand.vmem [shape: f32[1,16], index: 4, kind: input, shape index: {}]   ;;  %s1897_s5 = inlined_call_operand.vmem [shape: f32[512,16], index: 5, kind: output, shape index: {}]  }
   0x1 LB: > { %s1089_s19 = sadd.s32 4294967295, %s1254_s18   ;;  %p1093_p0 = scmp.ge.s32.totalorder %s1254_s18, 1  ;;  %s1254_s18 = sphi %s1286_s18, %s15_s18  }
   0x2   : > { %p188_p1 = scmp.lt.s32.totalorder %s1254_s18, 3 }
   0x4   : > { %p189_p2 = pnand %p1093_p0, %p188_p1 }
   0x5   : > { %v1183_v0 = vld [vmem:[%s1893_s1] sm:$0x3f] (!%p189_p2)   ;;  %vm340_vm0 = vcmask (!%p189_p2), 1045504   ;;  %s1094_s22 = sshll.u32 (!%p189_p2), %s1089_s19, 5  ;;  %vm291_vm1 = vcmask (!%p189_p2), 97280   ;;  %vm507_vm2 = vcmask (!%p189_p2), 130048  }
   0x6   : > { %192 = sbr.rel (%p189_p2) target bundleno = 613 (0x265), region = 40  ;;  %1173 = vmatprep.subr.msk.bf16.mxu0 (!%p189_p2), %vm340_vm0, %v1183_v0  ;;  %1174 = vmatprep.subr.msk.bf16.mxu1 (!%p189_p2), %vm340_vm0, %v1183_v0  ;;  %v342_v1 = vsel (!%p189_p2), %vm340_vm0, %v1183_v0, 0  ;;  %p217_p3 = scmp.lt.s32.totalorder (!%p189_p2), %s1094_s22, 63  ;;  %v1358_v50 = vld [vmem:[%s1894_s2] ss:$0 sm:$0xff] (!%p189_p2) }
   0x7   : > { %1138 = vmatpush3.bf16.msra.mxu0 (!%p189_p2), %v342_v1  ;;  %1172 = vmatpush3.bf16.msra.mxu1 (!%p189_p2), %v342_v1 }
   0xd   : > { %s1899_s22 = smov (!%p217_p3, %s1094_s22), 63 }
   0xe   : > { %s1095_s23 = sshll.u32 %s1899_s22, 3 }
   0xf   : > { %s1305_s26 = scalar_lea.vmem %s1892_s0, %s1095_s23  ;;  %s1729_s10 = scalar_lea.vmem %s1897_s5, %s1095_s23 }
  0x10   : > { %v229_v2 = vld [vmem:[%s1305_s26] sm:$0xff]  ;;  %v230_v3 = vld [vmem:[%s1305_s26 + $0x8] sm:$0xff]  ;;  %v231_v7 = vld [vmem:[%s1305_s26 + $0x10] sm:$0xff] }
  0x11   : > { %v245_v4 = vld [vmem:[%s1305_s26 + $0x80] sm:$0xff]  ;;  %v261_v5 = vpack.c.bf16 %v230_v3, %v229_v2  ;;  %v246_v6 = vld [vmem:[%s1305_s26 + $0x88] sm:$0xff]  ;;  %v232_v8 = vld [vmem:[%s1305_s26 + $0x18] sm:$0xff] }
  0x12   : > { %v269_v9 = vpack.c.bf16 %v246_v6, %v245_v4  ;;  %v262_v10 = vpack.c.bf16 %v232_v8, %v231_v7  ;;  %v247_v11 = vld [vmem:[%s1305_s26 + $0x90] sm:$0xff]  ;;  %v248_v12 = vld [vmem:[%s1305_s26 + $0x98] sm:$0xff]  ;;  %v233_v13 = vld [vmem:[%s1305_s26 + $0x20] sm:$0xff] }
  0x13   : > { %1139 = vmatprep.mubr.msk.bf16.mxu0 %vm291_vm1, %v261_v5  ;;  %v270_v14 = vpack.c.bf16 %v248_v12, %v247_v11  ;;  %v234_v15 = vld [vmem:[%s1305_s26 + $0x28] sm:$0xff]  ;;  %v249_v17 = vld [vmem:[%s1305_s26 + $0xa0] sm:$0xff]  ;;  %v235_v19 = vld [vmem:[%s1305_s26 + $0x30] sm:$0xff] }
  0x14   : > { %1155 = vmatprep.mubr.msk.bf16.mxu1 %vm291_vm1, %v269_v9  ;;  %1140 = vmatmul.mubr.msk.bf16.vlgmr.msra.gmra.mrb[0].mxu0 %vm291_vm1, %v262_v10  ;;  %v263_v16 = vpack.c.bf16 %v234_v15, %v233_v13  ;;  %v250_v18 = vld [vmem:[%s1305_s26 + $0xa8] sm:$0xff]  ;;  %v236_v20 = vld [vmem:[%s1305_s26 + $0x38] sm:$0xff]  ;;  %v251_v22 = vld [vmem:[%s1305_s26 + $0xb0] sm:$0xff] }
  0x15   : > { %1156 = vmatmul.mubr.msk.bf16.vlgmr.msra.gmra.mrb[0].mxu1 %vm291_vm1, %v270_v14  ;;  %v271_v21 = vpack.c.bf16 %v250_v18, %v249_v17  ;;  %v252_v23 = vld [vmem:[%s1305_s26 + $0xb8] sm:$0xff]  ;;  %v237_v24 = vld [vmem:[%s1305_s26 + $0x40] sm:$0xff]  ;;  %v238_v25 = vld [vmem:[%s1305_s26 + $0x48] sm:$0xff]  ;;  %v264_v28 = vpack.c.bf16 %v236_v20, %v235_v19 }
  0x16   : > { %1143 = vmatprep.mubr.msk.bf16.mxu0 %vm291_vm1, %v263_v16  ;;  %v253_v26 = vld [vmem:[%s1305_s26 + $0xc0] sm:$0xff]  ;;  %v254_v27 = vld [vmem:[%s1305_s26 + $0xc8] sm:$0xff]  ;;  %v272_v29 = vpack.c.bf16 %v252_v23, %v251_v22  ;;  %v265_v30 = vpack.c.bf16 %v238_v25, %v237_v24  ;;  %v239_v32 = vld [vmem:[%s1305_s26 + $0x50] sm:$0xff] }
  0x17   : > { %1159 = vmatprep.mubr.msk.bf16.mxu1 %vm291_vm1, %v271_v21  ;;  %v273_v31 = vpack.c.bf16 %v254_v27, %v253_v26  ;;  %v240_v33 = vld [vmem:[%s1305_s26 + $0x58] sm:$0xff]  ;;  %v255_v34 = vld [vmem:[%s1305_s26 + $0xd0] sm:$0xff]  ;;  %v241_v36 = vld [vmem:[%s1305_s26 + $0x60] sm:$0xff] }
  0x18   : > { %v256_v35 = vld [vmem:[%s1305_s26 + $0xd8] sm:$0xff]  ;;  %v242_v37 = vld [vmem:[%s1305_s26 + $0x68] sm:$0xff]  ;;  %v257_v38 = vld [vmem:[%s1305_s26 + $0xe0] sm:$0xff]  ;;  %v266_v40 = vpack.c.bf16 %v240_v33, %v239_v32 }
  0x19   : > { %v258_v39 = vld [vmem:[%s1305_s26 + $0xe8] sm:$0xff]  ;;  %v274_v41 = vpack.c.bf16 %v256_v35, %v255_v34  ;;  %v267_v42 = vpack.c.bf16 %v242_v37, %v241_v36  ;;  %v243_v44 = vld [vmem:[%s1305_s26 + $0x70] sm:$0xff]  ;;  %v244_v45 = vld [vmem:[%s1305_s26 + $0x78] sm:$0xff] }
  0x1a   : > { %v275_v43 = vpack.c.bf16 %v258_v39, %v257_v38  ;;  %v259_v46 = vld [vmem:[%s1305_s26 + $0xf0] sm:$0xff]  ;;  %v260_v47 = vld [vmem:[%s1305_s26 + $0xf8] sm:$0xff]  ;;  %v268_v48 = vpack.c.bf16 %v244_v45, %v243_v44 }
  0x1b   : > { %v276_v49 = vpack.c.bf16 %v260_v47, %v259_v46 }
  0x1c   : > { %1144 = vmatmul.mubr.msk.bf16.gmra.mrb[4].mxu0 %vm291_vm1, %v264_v28 }
  0x1d   : > { %1160 = vmatmul.mubr.msk.bf16.gmra.mrb[4].mxu1 %vm291_vm1, %v272_v29  ;;  %1147 = vmatprep.mubr.msk.bf16.mxu0 %vm291_vm1, %v265_v30 }
  0x1e   : > { %1163 = vmatprep.mubr.msk.bf16.mxu1 %vm291_vm1, %v273_v31 }
  0x24   : > { %1148 = vmatmul.mubr.msk.bf16.gmra.mrb[8].mxu0 %vm291_vm1, %v266_v40 }
  0x25   : > { %1164 = vmatmul.mubr.msk.bf16.gmra.mrb[8].mxu1 %vm291_vm1, %v274_v41  ;;  %1151 = vmatprep.mubr.msk.bf16.mxu0 %vm291_vm1, %v267_v42 }
  0x26   : > { %1167 = vmatprep.mubr.msk.bf16.mxu1 %vm291_vm1, %v275_v43 }
  0x2c   : > { %1152 = vmatmul.mubr.msk.bf16.gmra.mrb[12].mxu0 %vm291_vm1, %v268_v48 }
  0x2d   : > { %1168 = vmatmul.mubr.msk.bf16.gmra.mrb[12].mxu1 %vm291_vm1, %v276_v49 }
  0xe7   : > { %v1141_v51 = vpop.f32.mrb[0].mxu0 }
  0xe8   : > { %v1361_v52 = vadd.f32 %v1141_v51, %v1358_v50  ;;  %v1157_v53 = vpop.f32.mrb[0].mxu1  ;;  %v378_v54 = vpop.f32.mrb[1].mxu0 }
  0xe9   : > { %v1364_v55 = vadd.f32 %v1157_v53, %v1358_v50  ;;  %v442_v56 = vpop.f32.mrb[1].mxu1  ;;  %v1142_v57 = vpop.f32.mrb[2].mxu0  ;;  %v1372_v62 = vadd.f32 %v1358_v50, %v378_v54 }
  0xea   : > { %v1367_v58 = vadd.f32 %v1142_v57, %v1358_v50  ;;  %v1158_v59 = vpop.f32.mrb[2].mxu1  ;;  %v381_v60 = vpop.f32.mrb[3].mxu0  ;;  %v514_v61 = vsel %vm507_vm2, %v1361_v52, 0.0  ;;  %v1382_v3 = vadd.f32 %v1358_v50, %v442_v56 }
  0xeb   : > { %v445_v63 = vpop.f32.mrb[3].mxu1  ;;  %v562_v0 = vsel %vm507_vm2, %v1364_v55, 0.0  ;;  %515 = vadd.xlane.f32.xlu1 %v514_v61  ;;  %v1377_v1 = vadd.f32 %v1158_v59, %v1358_v50  ;;  %v508_v4 = vsel %vm507_vm2, %v1372_v62, 0.0  ;;  %v1392_v14 = vadd.f32 %v1358_v50, %v381_v60 }
  0xec   : > { %563 = vadd.xlane.f32.xlu0 %v562_v0  ;;  %v517_v2 = vsel %vm507_vm2, %v1367_v58, 0.0  ;;  %v1387_v10 = vadd.f32 %v1358_v50, %v445_v63  ;;  %v556_v15 = vsel %vm507_vm2, %v1382_v3, 0.0 }
  0xed   : > { %v565_v11 = vsel %vm507_vm2, %v1377_v1, 0.0  ;;  %v511_v20 = vsel %vm507_vm2, %v1392_v14, 0.0 }
  0xee   : > { %v559_v19 = vsel %vm507_vm2, %v1387_v10, 0.0 }
  0xef   : > { %518 = vadd.xlane.f32.xlu1 %v517_v2  ;;  %v1145_v5 = vpop.f32.mrb[4].mxu0 }
  0xf0   : > { %509 = vadd.xlane.f32.xlu0 %v508_v4  ;;  %v394_v6 = vpop.f32.mrb[5].mxu0  ;;  %v1161_v7 = vpop.f32.mrb[4].mxu1  ;;  %v1400_v18 = vadd.f32 %v1145_v5, %v1358_v50 }
  0xf1   : > { %v1146_v8 = vpop.f32.mrb[6].mxu0  ;;  %v458_v9 = vpop.f32.mrb[5].mxu1  ;;  %v1412_v26 = vadd.f32 %v1161_v7, %v1358_v50  ;;  %v1424_v36 = vadd.f32 %v1358_v50, %v394_v6 }
  0xf2   : > { %v397_v12 = vpop.f32.mrb[7].mxu0  ;;  %v1162_v13 = vpop.f32.mrb[6].mxu1  ;;  %v1397_v17 = vadd.f32 %v1146_v8, %v1358_v50  ;;  %v526_v27 = vsel %vm507_vm2, %v1400_v18, 0.0  ;;  %v1432_v46 = vadd.f32 %v1358_v50, %v458_v9 }
  0xf3   : > { %566 = vadd.xlane.f32.xlu1 %v565_v11  ;;  %v461_v16 = vpop.f32.mrb[7].mxu1  ;;  %v1407_v22 = vadd.f32 %v1162_v13, %v1358_v50  ;;  %v574_v34 = vsel %vm507_vm2, %v1412_v26, 0.0  ;;  %v1421_v35 = vadd.f32 %v1358_v50, %v397_v12  ;;  %v520_v47 = vsel %vm507_vm2, %v1424_v36, 0.0 }
  0xf4   : > { %557 = vadd.xlane.f32.xlu0 %v556_v15  ;;  %v529_v23 = vsel %vm507_vm2, %v1397_v17, 0.0  ;;  %v1427_v42 = vadd.f32 %v1358_v50, %v461_v16  ;;  %v568_v54 = vsel %vm507_vm2, %v1432_v46, 0.0 }
  0xf5   : > { %v577_v33 = vsel %vm507_vm2, %v1407_v22, 0.0  ;;  %v523_v43 = vsel %vm507_vm2, %v1421_v35, 0.0 }
  0xf6   : > { %v571_v53 = vsel %vm507_vm2, %v1427_v42, 0.0 }
  0xf7   : > { %560 = vadd.xlane.f32.xlu1 %v559_v19  ;;  %v1149_v21 = vpop.f32.mrb[8].mxu0 }
  0xf8   : > { %512 = vadd.xlane.f32.xlu0 %v511_v20  ;;  %v410_v24 = vpop.f32.mrb[9].mxu0  ;;  %v1165_v25 = vpop.f32.mrb[8].mxu1  ;;  %v1440_v51 = vadd.f32 %v1149_v21, %v1358_v50 }
  0xf9   : > { %v1150_v28 = vpop.f32.mrb[10].mxu0  ;;  %v474_v29 = vpop.f32.mrb[9].mxu1  ;;  %v1452_v59 = vadd.f32 %v1165_v25, %v1358_v50  ;;  %v1464_v2 = vadd.f32 %v1358_v50, %v410_v24 }
  0xfa   : > { %v413_v30 = vpop.f32.mrb[11].mxu0  ;;  %v1166_v31 = vpop.f32.mrb[10].mxu1  ;;  %v1437_v49 = vadd.f32 %v1150_v28, %v1358_v50  ;;  %v538_v60 = vsel %vm507_vm2, %v1440_v51, 0.0  ;;  %v1472_v6 = vadd.f32 %v1358_v50, %v474_v29 }
  0xfb   : > { %530 = vadd.xlane.f32.xlu1 %v529_v23  ;;  %v477_v32 = vpop.f32.mrb[11].mxu1  ;;  %v1447_v56 = vadd.f32 %v1166_v31, %v1358_v50  ;;  %v586_v63 = vsel %vm507_vm2, %v1452_v59, 0.0  ;;  %v1461_v0 = vadd.f32 %v1358_v50, %v413_v30  ;;  %v532_v7 = vsel %vm507_vm2, %v1464_v2, 0.0 }
  0xfc   : > { %527 = vadd.xlane.f32.xlu0 %v526_v27  ;;  %v541_v57 = vsel %vm507_vm2, %v1437_v49, 0.0  ;;  %v1467_v4 = vadd.f32 %v1358_v50, %v477_v32  ;;  %v580_v12 = vsel %vm507_vm2, %v1472_v6, 0.0 }
  0xfd   : > { %v589_v61 = vsel %vm507_vm2, %v1447_v56, 0.0  ;;  %v535_v5 = vsel %vm507_vm2, %v1461_v0, 0.0 }
  0xfe   : > { %v583_v11 = vsel %vm507_vm2, %v1467_v4, 0.0 }
  0xff   : > { %578 = vadd.xlane.f32.xlu1 %v577_v33  ;;  %v1153_v37 = vpop.f32.mrb[12].mxu0 }
 0x100   : > { %575 = vadd.xlane.f32.xlu0 %v574_v34  ;;  %v426_v38 = vpop.f32.mrb[13].mxu0  ;;  %v1169_v39 = vpop.f32.mrb[12].mxu1  ;;  %v1480_v9 = vadd.f32 %v1153_v37, %v1358_v50 }
 0x101   : > { %v1154_v40 = vpop.f32.mrb[14].mxu0  ;;  %v490_v41 = vpop.f32.mrb[13].mxu1  ;;  %v1494_v19 = vadd.f32 %v1358_v50, %v426_v38  ;;  %v1514_v29 = vadd.f32 %v1169_v39, %v1358_v50 }
 0x102   : > { %v429_v44 = vpop.f32.mrb[15].mxu0  ;;  %v1170_v45 = vpop.f32.mrb[14].mxu1  ;;  %v1477_v8 = vadd.f32 %v1154_v40, %v1358_v50  ;;  %v550_v15 = vsel %vm507_vm2, %v1480_v9, 0.0  ;;  %v1500_v21 = vadd.f32 %v1358_v50, %v490_v41 }
 0x103   : > { %524 = vadd.xlane.f32.xlu1 %v523_v43  ;;  %v493_v48 = vpop.f32.mrb[15].mxu1  ;;  %v1491_v16 = vadd.f32 %v1358_v50, %v429_v44  ;;  %v544_v24 = vsel %vm507_vm2, %v1494_v19, 0.0  ;;  %v1511_v28 = vadd.f32 %v1170_v45, %v1358_v50  ;;  %v598_v31 = vsel %vm507_vm2, %v1514_v29, 0.0 }
 0x104   : > { %521 = vadd.xlane.f32.xlu0 %v520_v47  ;;  %v553_v13 = vsel %vm507_vm2, %v1477_v8, 0.0  ;;  %v1497_v20 = vadd.f32 %v1358_v50, %v493_v48  ;;  %v592_v27 = vsel %vm507_vm2, %v1500_v21, 0.0 }
 0x105   : > { %v547_v23 = vsel %vm507_vm2, %v1491_v16, 0.0  ;;  %v601_v30 = vsel %vm507_vm2, %v1511_v28, 0.0 }
 0x106   : > { %v595_v25 = vsel %vm507_vm2, %v1497_v20, 0.0 }
 0x107   : > { %572 = vadd.xlane.f32.xlu1 %v571_v53 }
 0x108   : > { %569 = vadd.xlane.f32.xlu0 %v568_v54 }
 0x10b   : > { %542 = vadd.xlane.f32.xlu1 %v541_v57 }
 0x10c   : > { %539 = vadd.xlane.f32.xlu0 %v538_v60 }
 0x10f   : > { %590 = vadd.xlane.f32.xlu1 %v589_v61 }
 0x110   : > { %587 = vadd.xlane.f32.xlu0 %v586_v63 }
 0x113   : > { %536 = vadd.xlane.f32.xlu1 %v535_v5 }
 0x114   : > { %533 = vadd.xlane.f32.xlu0 %v532_v7 }
 0x117   : > { %584 = vadd.xlane.f32.xlu1 %v583_v11 }
 0x118   : > { %581 = vadd.xlane.f32.xlu0 %v580_v12 }
 0x11b   : > { %554 = vadd.xlane.f32.xlu1 %v553_v13 }
 0x11c   : > { %551 = vadd.xlane.f32.xlu0 %v550_v15 }
 0x11f   : > { %548 = vadd.xlane.f32.xlu1 %v547_v23 }
 0x120   : > { %545 = vadd.xlane.f32.xlu0 %v544_v24 }
 0x123   : > { %596 = vadd.xlane.f32.xlu1 %v595_v25 }
 0x124   : > { %593 = vadd.xlane.f32.xlu0 %v592_v27 }
 0x127   : > { %602 = vadd.xlane.f32.xlu1 %v601_v30 }
 0x128   : > { %599 = vadd.xlane.f32.xlu0 %v598_v31 }
 0x178   : > { %v516_v32 = vpop.xlane.xlu1 %515 }
 0x179   : > { %v564_v33 = vpop.xlane.xlu0 %563  ;;  %v607_v34 = vmul.f32 0.0625, %v516_v32 }
 0x17a   : > { %v623_v37 = vmul.f32 0.0625, %v564_v33 }
 0x17b   : > { %v1521_v38 = vsub.f32 %v1361_v52, %v607_v34 }
 0x17c   : > { %v1524_v50 = vsub.f32 %v1364_v55, %v623_v37  ;;  %v519_v39 = vpop.xlane.xlu1 %518 }
 0x17d   : > { %v608_v40 = vmul.f32 0.0625, %v519_v39  ;;  %v510_v41 = vpop.xlane.xlu0 %509  ;;  %v671_v43 = vmul.f32 %v1521_v38, %v1521_v38 }
 0x17e   : > { %v605_v44 = vmul.f32 0.0625, %v510_v41  ;;  %v687_v48 = vmul.f32 %v1524_v50, %v1524_v50 }
 0x17f   : > { %v1529_v45 = vsub.f32 %v1367_v58, %v608_v40  ;;  %v707_v47 = vsel %vm507_vm2, %v671_v43, 0.0 }
 0x180   : > { %v1535_v52 = vsub.f32 %v1372_v62, %v605_v44  ;;  %v567_v55 = vpop.xlane.xlu1 %566  ;;  %708 = vadd.xlane.f32.xlu0 %v707_v47  ;;  %v755_v63 = vsel %vm507_vm2, %v687_v48, 0.0 }
 0x181   : > { %v624_v53 = vmul.f32 0.0625, %v567_v55  ;;  %v558_v54 = vpop.xlane.xlu0 %557  ;;  %v672_v57 = vmul.f32 %v1529_v45, %v1529_v45 }
 0x182   : > { %v621_v60 = vmul.f32 0.0625, %v558_v54  ;;  %v669_v5 = vmul.f32 %v1535_v52, %v1535_v52 }
 0x183   : > { %v1540_v61 = vsub.f32 %v1377_v1, %v624_v53  ;;  %v710_v58 = vsel %vm507_vm2, %v672_v57, 0.0 }
 0x184   : > { %v1547_v62 = vsub.f32 %v1382_v3, %v621_v60  ;;  %v561_v7 = vpop.xlane.xlu1 %560  ;;  %711 = vadd.xlane.f32.xlu1 %v710_v58  ;;  %756 = vadd.xlane.f32.xlu0 %v755_v63  ;;  %v701_v23 = vsel %vm507_vm2, %v669_v5, 0.0 }
 0x185   : > { %v622_v11 = vmul.f32 0.0625, %v561_v7  ;;  %v513_v12 = vpop.xlane.xlu0 %512  ;;  %v688_v13 = vmul.f32 %v1540_v61, %v1540_v61 }
 0x186   : > { %v606_v1 = vmul.f32 0.0625, %v513_v12  ;;  %v685_v24 = vmul.f32 %v1547_v62, %v1547_v62 }
 0x187   : > { %v758_v15 = vsel %vm507_vm2, %v688_v13, 0.0  ;;  %v1556_v25 = vsub.f32 %v1387_v10, %v622_v11 }
 0x188   : > { %v1559_v3 = vsub.f32 %v1392_v14, %v606_v1  ;;  %v531_v27 = vpop.xlane.xlu1 %530  ;;  %759 = vadd.xlane.f32.xlu1 %v758_v15  ;;  %702 = vadd.xlane.f32.xlu0 %v701_v23  ;;  %v749_v37 = vsel %vm507_vm2, %v685_v24, 0.0 }
 0x189   : > { %v612_v30 = vmul.f32 0.0625, %v531_v27  ;;  %v528_v31 = vpop.xlane.xlu0 %527  ;;  %v686_v40 = vmul.f32 %v1556_v25, %v1556_v25 }
 0x18a   : > { %v611_v32 = vmul.f32 0.0625, %v528_v31  ;;  %v670_v33 = vmul.f32 %v1559_v3, %v1559_v3 }
 0x18b   : > { %v1564_v34 = vsub.f32 %v1397_v17, %v612_v30  ;;  %v752_v53 = vsel %vm507_vm2, %v686_v40, 0.0 }
 0x18c   : > { %v1568_v10 = vsub.f32 %v1400_v18, %v611_v32  ;;  %v579_v39 = vpop.xlane.xlu1 %578  ;;  %750 = vadd.xlane.f32.xlu0 %v749_v37  ;;  %v704_v14 = vsel %vm507_vm2, %v670_v33, 0.0 }
 0x18d   : > { %v628_v41 = vmul.f32 0.0625, %v579_v39  ;;  %705 = vadd.xlane.f32.xlu1 %v704_v14  ;;  %v576_v43 = vpop.xlane.xlu0 %575  ;;  %v676_v47 = vmul.f32 %v1564_v34, %v1564_v34 }
 0x18e   : > { %v627_v44 = vmul.f32 0.0625, %v576_v43  ;;  %v675_v17 = vmul.f32 %v1568_v10, %v1568_v10 }
 0x18f   : > { %v1578_v18 = vsub.f32 %v1407_v22, %v628_v41  ;;  %v722_v5 = vsel %vm507_vm2, %v676_v47, 0.0 }
 0x190   : > { %v1581_v48 = vsub.f32 %v1412_v26, %v627_v44  ;;  %v525_v55 = vpop.xlane.xlu1 %524  ;;  %v719_v54 = vsel %vm507_vm2, %v675_v17, 0.0 }
 0x191   : > { %v610_v57 = vmul.f32 0.0625, %v525_v55  ;;  %753 = vadd.xlane.f32.xlu1 %v752_v53  ;;  %720 = vadd.xlane.f32.xlu0 %v719_v54  ;;  %v522_v60 = vpop.xlane.xlu0 %521  ;;  %v692_v12 = vmul.f32 %v1578_v18, %v1578_v18 }
 0x192   : > { %v609_v58 = vmul.f32 0.0625, %v522_v60  ;;  %v691_v63 = vmul.f32 %v1581_v48, %v1581_v48 }
 0x193   : > { %v1589_v22 = vsub.f32 %v1421_v35, %v610_v57  ;;  %v770_v27 = vsel %vm507_vm2, %v692_v12, 0.0 }
 0x194   : > { %v1592_v26 = vsub.f32 %v1424_v36, %v609_v58  ;;  %v573_v7 = vpop.xlane.xlu1 %572  ;;  %v767_v11 = vsel %vm507_vm2, %v691_v63, 0.0 }
 0x195   : > { %v626_v13 = vmul.f32 0.0625, %v573_v7  ;;  %723 = vadd.xlane.f32.xlu1 %v722_v5  ;;  %768 = vadd.xlane.f32.xlu0 %v767_v11  ;;  %v570_v1 = vpop.xlane.xlu0 %569  ;;  %v674_v31 = vmul.f32 %v1589_v22, %v1589_v22 }
 0x196   : > { %v625_v15 = vmul.f32 0.0625, %v570_v1  ;;  %v673_v23 = vmul.f32 %v1592_v26, %v1592_v26 }
 0x197   : > { %v1600_v35 = vsub.f32 %v1427_v42, %v626_v13  ;;  %v716_v41 = vsel %vm507_vm2, %v674_v31, 0.0 }
 0x198   : > { %v1603_v36 = vsub.f32 %v1432_v46, %v625_v15  ;;  %v543_v24 = vpop.xlane.xlu1 %542  ;;  %v713_v30 = vsel %vm507_vm2, %v673_v23, 0.0 }
 0x199   : > { %v616_v32 = vmul.f32 0.0625, %v543_v24  ;;  %771 = vadd.xlane.f32.xlu1 %v770_v27  ;;  %714 = vadd.xlane.f32.xlu0 %v713_v30  ;;  %v540_v33 = vpop.xlane.xlu0 %539  ;;  %v690_v46 = vmul.f32 %v1600_v35, %v1600_v35 }
 0x19a   : > { %v615_v37 = vmul.f32 0.0625, %v540_v33  ;;  %v689_v42 = vmul.f32 %v1603_v36, %v1603_v36 }
 0x19b   : > { %v1614_v39 = vsub.f32 %v1437_v49, %v616_v32  ;;  %v764_v53 = vsel %vm507_vm2, %v690_v46, 0.0 }
 0x19c   : > { %v1617_v14 = vsub.f32 %v1440_v51, %v615_v37  ;;  %v591_v40 = vpop.xlane.xlu1 %590  ;;  %v761_v43 = vsel %vm507_vm2, %v689_v42, 0.0 }
 0x19d   : > { %v632_v44 = vmul.f32 0.0625, %v591_v40  ;;  %717 = vadd.xlane.f32.xlu1 %v716_v41  ;;  %762 = vadd.xlane.f32.xlu0 %v761_v43  ;;  %v588_v17 = vpop.xlane.xlu0 %587  ;;  %v680_v60 = vmul.f32 %v1614_v39, %v1614_v39 }
 0x19e   : > { %v631_v47 = vmul.f32 0.0625, %v588_v17  ;;  %v679_v55 = vmul.f32 %v1617_v14, %v1617_v14 }
 0x19f   : > { %v1625_v49 = vsub.f32 %v1447_v56, %v632_v44  ;;  %v734_v12 = vsel %vm507_vm2, %v680_v60, 0.0 }
 0x1a0   : > { %v1628_v51 = vsub.f32 %v1452_v59, %v631_v47  ;;  %v537_v54 = vpop.xlane.xlu1 %536  ;;  %v731_v57 = vsel %vm507_vm2, %v679_v55, 0.0 }
 0x1a1   : > { %v614_v58 = vmul.f32 0.0625, %v537_v54  ;;  %765 = vadd.xlane.f32.xlu1 %v764_v53  ;;  %732 = vadd.xlane.f32.xlu0 %v731_v57  ;;  %v534_v63 = vpop.xlane.xlu0 %533  ;;  %v696_v1 = vmul.f32 %v1625_v49, %v1625_v49 }
 0x1a2   : > { %v613_v5 = vmul.f32 0.0625, %v534_v63  ;;  %v695_v7 = vmul.f32 %v1628_v51, %v1628_v51 }
 0x1a3   : > { %v1636_v56 = vsub.f32 %v1461_v0, %v614_v58  ;;  %v782_v32 = vsel %vm507_vm2, %v696_v1, 0.0 }
 0x1a4   : > { %v1639_v59 = vsub.f32 %v1464_v2, %v613_v5  ;;  %v585_v11 = vpop.xlane.xlu1 %584  ;;  %v779_v13 = vsel %vm507_vm2, %v695_v7, 0.0 }
 0x1a5   : > { %v630_v15 = vmul.f32 0.0625, %v585_v11  ;;  %735 = vadd.xlane.f32.xlu1 %v734_v12  ;;  %780 = vadd.xlane.f32.xlu0 %v779_v13  ;;  %v582_v23 = vpop.xlane.xlu0 %581  ;;  %v678_v2 = vmul.f32 %v1636_v56, %v1636_v56 }
 0x1a6   : > { %v629_v24 = vmul.f32 0.0625, %v582_v23  ;;  %v677_v0 = vmul.f32 %v1639_v59, %v1639_v59 }
 0x1a7   : > { %v1650_v27 = vsub.f32 %v1467_v4, %v630_v15  ;;  %v728_v41 = vsel %vm507_vm2, %v678_v2, 0.0 }
 0x1a8   : > { %v1653_v30 = vsub.f32 %v1472_v6, %v629_v24  ;;  %v555_v31 = vpop.xlane.xlu1 %554  ;;  %v725_v33 = vsel %vm507_vm2, %v677_v0, 0.0 }
 0x1a9   : > { %v620_v37 = vmul.f32 0.0625, %v555_v31  ;;  %783 = vadd.xlane.f32.xlu1 %v782_v32  ;;  %726 = vadd.xlane.f32.xlu0 %v725_v33  ;;  %v552_v42 = vpop.xlane.xlu0 %551  ;;  %v694_v17 = vmul.f32 %v1650_v27, %v1650_v27 }
 0x1aa   : > { %v619_v46 = vmul.f32 0.0625, %v552_v42  ;;  %v693_v40 = vmul.f32 %v1653_v30, %v1653_v30 }
 0x1ab   : > { %v1661_v4 = vsub.f32 %v1477_v8, %v620_v37  ;;  %v776_v60 = vsel %vm507_vm2, %v694_v17, 0.0 }
 0x1ac   : > { %v1664_v6 = vsub.f32 %v1480_v9, %v619_v46  ;;  %v549_v43 = vpop.xlane.xlu1 %548  ;;  %v773_v44 = vsel %vm507_vm2, %v693_v40, 0.0 }
 0x1ad   : > { %v618_v47 = vmul.f32 0.0625, %v549_v43  ;;  %729 = vadd.xlane.f32.xlu1 %v728_v41  ;;  %774 = vadd.xlane.f32.xlu0 %v773_v44  ;;  %v546_v55 = vpop.xlane.xlu0 %545  ;;  %v684_v63 = vmul.f32 %v1661_v4, %v1661_v4 }
 0x1ae   : > { %v617_v53 = vmul.f32 0.0625, %v546_v55  ;;  %v683_v54 = vmul.f32 %v1664_v6, %v1664_v6 }
 0x1af   : > { %v1672_v8 = vsub.f32 %v1491_v16, %v618_v47  ;;  %v746_v15 = vsel %vm507_vm2, %v684_v63, 0.0 }
 0x1b0   : > { %v1675_v9 = vsub.f32 %v1494_v19, %v617_v53  ;;  %v597_v57 = vpop.xlane.xlu1 %596  ;;  %v743_v58 = vsel %vm507_vm2, %v683_v54, 0.0 }
 0x1b1   : > { %v634_v5 = vmul.f32 0.0625, %v597_v57  ;;  %777 = vadd.xlane.f32.xlu1 %v776_v60  ;;  %744 = vadd.xlane.f32.xlu0 %v743_v58  ;;  %v594_v7 = vpop.xlane.xlu0 %593  ;;  %v682_v19 = vmul.f32 %v1672_v8, %v1672_v8 }
 0x1b2   : > { %v633_v11 = vmul.f32 0.0625, %v594_v7  ;;  %v681_v16 = vmul.f32 %v1675_v9, %v1675_v9 }
 0x1b3   : > { %v1686_v12 = vsub.f32 %v1497_v20, %v634_v5  ;;  %v740_v32 = vsel %vm507_vm2, %v682_v19, 0.0 }
 0x1b4   : > { %v1689_v13 = vsub.f32 %v1500_v21, %v633_v11  ;;  %v603_v1 = vpop.xlane.xlu1 %602  ;;  %v737_v23 = vsel %vm507_vm2, %v681_v16, 0.0 }
 0x1b5   : > { %v636_v24 = vmul.f32 0.0625, %v603_v1  ;;  %747 = vadd.xlane.f32.xlu1 %v746_v15  ;;  %738 = vadd.xlane.f32.xlu0 %v737_v23  ;;  %v600_v0 = vpop.xlane.xlu0 %599  ;;  %v698_v37 = vmul.f32 %v1686_v12, %v1686_v12 }
 0x1b6   : > { %v635_v2 = vmul.f32 0.0625, %v600_v0  ;;  %v697_v31 = vmul.f32 %v1689_v13, %v1689_v13 }
 0x1b7   : > { %v1697_v20 = vsub.f32 %v1511_v28, %v636_v24  ;;  %v788_v46 = vsel %vm507_vm2, %v698_v37, 0.0  ;;  %v1715_v24 = vld [vmem:[%s1895_s3] ss:$0 sm:$0xff] }
 0x1b8   : > { %v1700_v21 = vsub.f32 %v1514_v29, %v635_v2  ;;  %v785_v33 = vsel %vm507_vm2, %v697_v31, 0.0 }
 0x1b9   : > { %741 = vadd.xlane.f32.xlu1 %v740_v32  ;;  %786 = vadd.xlane.f32.xlu0 %v785_v33  ;;  %v700_v28 = vmul.f32 %v1697_v20, %v1697_v20  ;;  %v1721_v32 = vld [vmem:[%s1896_s4] ss:$0 sm:$0xff] }
 0x1ba   : > { %v699_v42 = vmul.f32 %v1700_v21, %v1700_v21 }
 0x1bb   : > { %v794_v29 = vsel %vm507_vm2, %v700_v28, 0.0 }
 0x1bc   : > { %v791_v40 = vsel %vm507_vm2, %v699_v42, 0.0 }
 0x1bd   : > { %789 = vadd.xlane.f32.xlu1 %v788_v46  ;;  %792 = vadd.xlane.f32.xlu0 %v791_v40 }
 0x1c1   : > { %795 = vadd.xlane.f32.xlu1 %v794_v29 }
 0x20d   : > { %v709_v41 = vpop.xlane.xlu0 %708 }
 0x20e   : > { %v799_v43 = vmul.f32 0.0625, %v709_v41 }
 0x210   : > { %v831_v44 = vadd.f32 1e-05, %v799_v43 }
 0x211   : > { %v712_v17 = vpop.xlane.xlu1 %711  ;;  %v757_v47 = vpop.xlane.xlu0 %756 }
 0x212   : > { %1184 = vrsqrt.f32 %v831_v44  ;;  %v800_v55 = vmul.f32 0.0625, %v712_v17  ;;  %v815_v53 = vmul.f32 0.0625, %v757_v47 }
 0x214   : > { %v832_v54 = vadd.f32 1e-05, %v800_v55  ;;  %v847_v57 = vadd.f32 1e-05, %v815_v53 }
 0x215   : > { %v760_v60 = vpop.xlane.xlu1 %759  ;;  %v703_v58 = vpop.xlane.xlu0 %702 }
 0x216   : > { %1186 = vrsqrt.f32 %v832_v54  ;;  %v816_v63 = vmul.f32 0.0625, %v760_v60  ;;  %v797_v5 = vmul.f32 0.0625, %v703_v58 }
 0x217   : > { %1188 = vrsqrt.f32 %v847_v57 }
 0x218   : > { %v848_v7 = vadd.f32 1e-05, %v816_v63  ;;  %v829_v11 = vadd.f32 1e-05, %v797_v5 }
 0x219   : > { %v751_v16 = vpop.xlane.xlu0 %750 }
 0x21a   : > { %1190 = vrsqrt.f32 %v848_v7  ;;  %v706_v19 = vpop.xlane.xlu1 %705  ;;  %v813_v1 = vmul.f32 0.0625, %v751_v16 }
 0x21b   : > { %1192 = vrsqrt.f32 %v829_v11  ;;  %v798_v15 = vmul.f32 0.0625, %v706_v19 }
 0x21c   : > { %v1185_v23 = vpop.eup %1184  ;;  %v845_v0 = vadd.f32 1e-05, %v813_v1 }
 0x21d   : > { %v895_v2 = vmul.f32 %v1185_v23, %v1521_v38  ;;  %v830_v31 = vadd.f32 1e-05, %v798_v15 }
 0x21e   : > { %1194 = vrsqrt.f32 %v845_v0  ;;  %v754_v33 = vpop.xlane.xlu1 %753  ;;  %v721_v37 = vpop.xlane.xlu0 %720 }
 0x21f   : > { %v933_v42 = vmul.f32 %v1715_v24, %v895_v2  ;;  %1196 = vrsqrt.f32 %v830_v31  ;;  %v814_v46 = vmul.f32 0.0625, %v754_v33  ;;  %v803_v40 = vmul.f32 0.0625, %v721_v37 }
 0x220   : > { %v1187_v28 = vpop.eup %1186 }
 0x221   : > { %v1189_v38 = vpop.eup %1188  ;;  %v971_v29 = vadd.f32 %v1721_v32, %v933_v42  ;;  %v896_v41 = vmul.f32 %v1187_v28, %v1529_v45  ;;  %v846_v43 = vadd.f32 1e-05, %v814_v46  ;;  %v835_v44 = vadd.f32 1e-05, %v803_v40 }
 0x222   : > { %v911_v17 = vmul.f32 %v1189_v38, %v1524_v50  ;;  %v724_v47 = vpop.xlane.xlu1 %723  ;;  %v769_v55 = vpop.xlane.xlu0 %768 }
 0x223   : > { %1003 = vst.msk [vmem:[%s1729_s10 + $0x10] sm:$0xff] %vm507_vm2, %v971_v29  ;;  %v934_v53 = vmul.f32 %v1715_v24, %v896_v41  ;;  %1198 = vrsqrt.f32 %v846_v43  ;;  %v804_v54 = vmul.f32 0.0625, %v724_v47  ;;  %v819_v57 = vmul.f32 0.0625, %v769_v55 }
 0x224   : > { %v1191_v60 = vpop.eup %1190  ;;  %v949_v58 = vmul.f32 %v1715_v24, %v911_v17  ;;  %1200 = vrsqrt.f32 %v835_v44 }
 0x225   : > { %v1193_v45 = vpop.eup %1192  ;;  %v972_v63 = vadd.f32 %v1721_v32, %v934_v53  ;;  %v912_v50 = vmul.f32 %v1191_v60, %v1540_v61  ;;  %v836_v5 = vadd.f32 1e-05, %v804_v54  ;;  %v851_v7 = vadd.f32 1e-05, %v819_v57 }
 0x226   : > { %v987_v11 = vadd.f32 %v1721_v32, %v949_v58  ;;  %v893_v16 = vmul.f32 %v1193_v45, %v1535_v52  ;;  %v772_v19 = vpop.xlane.xlu1 %771  ;;  %v715_v1 = vpop.xlane.xlu0 %714 }
 0x227   : > { %1004 = vst.msk [vmem:[%s1729_s10 + $0x18] sm:$0xff] %vm507_vm2, %v972_v63  ;;  %v950_v15 = vmul.f32 %v1715_v24, %v912_v50  ;;  %1202 = vrsqrt.f32 %v836_v5  ;;  %v820_v23 = vmul.f32 0.0625, %v772_v19  ;;  %v801_v0 = vmul.f32 0.0625, %v715_v1 }
 0x228   : > { %v1195_v2 = vpop.eup %1194  ;;  %1019 = vst.msk [vmem:[%s1729_s10 + $0x90] sm:$0xff] %vm507_vm2, %v987_v11  ;;  %v931_v61 = vmul.f32 %v1715_v24, %v893_v16  ;;  %1204 = vrsqrt.f32 %v851_v7 }
 0x229   : > { %v1197_v31 = vpop.eup %1196  ;;  %v988_v52 = vadd.f32 %v1721_v32, %v950_v15  ;;  %v909_v33 = vmul.f32 %v1195_v2, %v1547_v62  ;;  %v852_v37 = vadd.f32 1e-05, %v820_v23  ;;  %v833_v42 = vadd.f32 1e-05, %v801_v0 }
 0x22a   : > { %v969_v46 = vadd.f32 %v1721_v32, %v931_v61  ;;  %v894_v40 = vmul.f32 %v1197_v31, %v1559_v3  ;;  %v718_v28 = vpop.xlane.xlu1 %717  ;;  %v763_v38 = vpop.xlane.xlu0 %762 }
 0x22b   : > { %1020 = vst.msk [vmem:[%s1729_s10 + $0x98] sm:$0xff] %vm507_vm2, %v988_v52  ;;  %v947_v29 = vmul.f32 %v1715_v24, %v909_v33  ;;  %1206 = vrsqrt.f32 %v852_v37  ;;  %v802_v41 = vmul.f32 0.0625, %v718_v28  ;;  %v817_v43 = vmul.f32 0.0625, %v763_v38 }
 0x22c   : > { %1001 = vst.msk [vmem:[%s1729_s10] sm:$0xff] %vm507_vm2, %v969_v46  ;;  %v932_v62 = vmul.f32 %v1715_v24, %v894_v40  ;;  %1208 = vrsqrt.f32 %v833_v42 }
 0x22d   : > { %v1199_v44 = vpop.eup %1198  ;;  %v985_v17 = vadd.f32 %v1721_v32, %v947_v29  ;;  %v834_v3 = vadd.f32 1e-05, %v802_v41  ;;  %v849_v47 = vadd.f32 1e-05, %v817_v43 }
 0x22e   : > { %v1201_v55 = vpop.eup %1200  ;;  %v970_v53 = vadd.f32 %v1721_v32, %v932_v62  ;;  %v910_v54 = vmul.f32 %v1199_v44, %v1556_v25  ;;  %v766_v57 = vpop.xlane.xlu1 %765 }
 0x22f   : > { %v733_v60 = vpop.xlane.xlu0 %732  ;;  %1017 = vst.msk [vmem:[%s1729_s10 + $0x80] sm:$0xff] %vm507_vm2, %v985_v17  ;;  %v899_v58 = vmul.f32 %v1201_v55, %v1568_v10  ;;  %1210 = vrsqrt.f32 %v834_v3  ;;  %v818_v45 = vmul.f32 0.0625, %v766_v57 }
 0x230   : > { %v807_v63 = vmul.f32 0.0625, %v733_v60  ;;  %1002 = vst.msk [vmem:[%s1729_s10 + $0x8] sm:$0xff] %vm507_vm2, %v970_v53  ;;  %v948_v50 = vmul.f32 %v1715_v24, %v910_v54  ;;  %1212 = vrsqrt.f32 %v849_v47 }
 0x231   : > { %v1203_v5 = vpop.eup %1202  ;;  %v937_v7 = vmul.f32 %v1715_v24, %v899_v58  ;;  %v850_v11 = vadd.f32 1e-05, %v818_v45 }
 0x232   : > { %v839_v25 = vadd.f32 1e-05, %v807_v63  ;;  %v1205_v16 = vpop.eup %1204  ;;  %v986_v19 = vadd.f32 %v1721_v32, %v948_v50  ;;  %v900_v10 = vmul.f32 %v1203_v5, %v1564_v34  ;;  %v736_v1 = vpop.xlane.xlu1 %735 }
 0x233   : > { %v781_v15 = vpop.xlane.xlu0 %780  ;;  %v975_v23 = vadd.f32 %v1721_v32, %v937_v7  ;;  %v915_v0 = vmul.f32 %v1205_v16, %v1581_v48  ;;  %1214 = vrsqrt.f32 %v850_v11  ;;  %v808_v2 = vmul.f32 0.0625, %v736_v1 }
 0x234   : > { %1018 = vst.msk [vmem:[%s1729_s10 + $0x88] sm:$0xff] %vm507_vm2, %v986_v19  ;;  %v938_v61 = vmul.f32 %v1715_v24, %v900_v10  ;;  %1216 = vrsqrt.f32 %v839_v25  ;;  %v823_v31 = vmul.f32 0.0625, %v781_v15 }
 0x235   : > { %v1207_v52 = vpop.eup %1206  ;;  %1007 = vst.msk [vmem:[%s1729_s10 + $0x30] sm:$0xff] %vm507_vm2, %v975_v23  ;;  %v953_v34 = vmul.f32 %v1715_v24, %v915_v0  ;;  %v840_v33 = vadd.f32 1e-05, %v808_v2 }
 0x236   : > { %v1209_v37 = vpop.eup %1208  ;;  %v976_v42 = vadd.f32 %v1721_v32, %v938_v61  ;;  %v916_v48 = vmul.f32 %v1207_v52, %v1578_v18  ;;  %v855_v46 = vadd.f32 1e-05, %v823_v31  ;;  %v784_v40 = vpop.xlane.xlu1 %783 }
 0x237   : > { %v727_v28 = vpop.xlane.xlu0 %726  ;;  %v991_v38 = vadd.f32 %v1721_v32, %v953_v34  ;;  %v897_v29 = vmul.f32 %v1209_v37, %v1592_v26  ;;  %1218 = vrsqrt.f32 %v840_v33  ;;  %v824_v41 = vmul.f32 0.0625, %v784_v40 }
 0x238   : > { %1008 = vst.msk [vmem:[%s1729_s10 + $0x38] sm:$0xff] %vm507_vm2, %v976_v42  ;;  %v954_v43 = vmul.f32 %v1715_v24, %v916_v48  ;;  %1220 = vrsqrt.f32 %v855_v46  ;;  %v805_v62 = vmul.f32 0.0625, %v727_v28 }
 0x239   : > { %v1211_v44 = vpop.eup %1210  ;;  %1023 = vst.msk [vmem:[%s1729_s10 + $0xb0] sm:$0xff] %vm507_vm2, %v991_v38  ;;  %v935_v18 = vmul.f32 %v1715_v24, %v897_v29  ;;  %v856_v17 = vadd.f32 1e-05, %v824_v41 }
 0x23a   : > { %v1213_v3 = vpop.eup %1212  ;;  %v992_v47 = vadd.f32 %v1721_v32, %v954_v43  ;;  %v898_v26 = vmul.f32 %v1211_v44, %v1589_v22  ;;  %v837_v55 = vadd.f32 1e-05, %v805_v62  ;;  %v730_v53 = vpop.xlane.xlu1 %729 }
 0x23b   : > { %v775_v54 = vpop.xlane.xlu0 %774  ;;  %v973_v57 = vadd.f32 %v1721_v32, %v935_v18  ;;  %v913_v60 = vmul.f32 %v1213_v3, %v1603_v36  ;;  %1222 = vrsqrt.f32 %v856_v17  ;;  %v806_v58 = vmul.f32 0.0625, %v730_v53 }
 0x23c   : > { %1024 = vst.msk [vmem:[%s1729_s10 + $0xb8] sm:$0xff] %vm507_vm2, %v992_v47  ;;  %v936_v45 = vmul.f32 %v1715_v24, %v898_v26  ;;  %1224 = vrsqrt.f32 %v837_v55  ;;  %v821_v63 = vmul.f32 0.0625, %v775_v54 }
 0x23d   : > { %v1215_v50 = vpop.eup %1214  ;;  %1005 = vst.msk [vmem:[%s1729_s10 + $0x20] sm:$0xff] %vm507_vm2, %v973_v57  ;;  %v951_v22 = vmul.f32 %v1715_v24, %v913_v60  ;;  %v838_v5 = vadd.f32 1e-05, %v806_v58 }
 0x23e   : > { %v1217_v7 = vpop.eup %1216  ;;  %v974_v11 = vadd.f32 %v1721_v32, %v936_v45  ;;  %v914_v36 = vmul.f32 %v1215_v50, %v1600_v35  ;;  %v853_v25 = vadd.f32 1e-05, %v821_v63  ;;  %v778_v16 = vpop.xlane.xlu1 %777 }
 0x23f   : > { %v745_v19 = vpop.xlane.xlu0 %744  ;;  %v989_v10 = vadd.f32 %v1721_v32, %v951_v22  ;;  %v903_v1 = vmul.f32 %v1217_v7, %v1617_v14  ;;  %1226 = vrsqrt.f32 %v838_v5  ;;  %v822_v15 = vmul.f32 0.0625, %v778_v16 }
 0x240   : > { %1006 = vst.msk [vmem:[%s1729_s10 + $0x28] sm:$0xff] %vm507_vm2, %v974_v11  ;;  %v952_v23 = vmul.f32 %v1715_v24, %v914_v36  ;;  %1228 = vrsqrt.f32 %v853_v25  ;;  %v811_v0 = vmul.f32 0.0625, %v745_v19 }
 0x241   : > { %v1219_v2 = vpop.eup %1218  ;;  %1021 = vst.msk [vmem:[%s1729_s10 + $0xa0] sm:$0xff] %vm507_vm2, %v989_v10  ;;  %v941_v35 = vmul.f32 %v1715_v24, %v903_v1  ;;  %v854_v61 = vadd.f32 1e-05, %v822_v15 }
 0x242   : > { %v1221_v31 = vpop.eup %1220  ;;  %v990_v52 = vadd.f32 %v1721_v32, %v952_v23  ;;  %v904_v14 = vmul.f32 %v1219_v2, %v1614_v39  ;;  %v843_v34 = vadd.f32 1e-05, %v811_v0  ;;  %v748_v33 = vpop.xlane.xlu1 %747 }
 0x243   : > { %v739_v37 = vpop.xlane.xlu0 %738  ;;  %v979_v42 = vadd.f32 %v1721_v32, %v941_v35  ;;  %v919_v48 = vmul.f32 %v1221_v31, %v1628_v51  ;;  %1230 = vrsqrt.f32 %v854_v61  ;;  %v812_v46 = vmul.f32 0.0625, %v748_v33 }
 0x244   : > { %1022 = vst.msk [vmem:[%s1729_s10 + $0xa8] sm:$0xff] %vm507_vm2, %v990_v52  ;;  %v942_v40 = vmul.f32 %v1715_v24, %v904_v14  ;;  %1232 = vrsqrt.f32 %v843_v34  ;;  %v809_v28 = vmul.f32 0.0625, %v739_v37 }
 0x245   : > { %v1223_v38 = vpop.eup %1222  ;;  %1011 = vst.msk [vmem:[%s1729_s10 + $0x50] sm:$0xff] %vm507_vm2, %v979_v42  ;;  %v957_v39 = vmul.f32 %v1715_v24, %v919_v48  ;;  %v844_v29 = vadd.f32 1e-05, %v812_v46 }
 0x246   : > { %v1225_v41 = vpop.eup %1224  ;;  %v980_v43 = vadd.f32 %v1721_v32, %v942_v40  ;;  %v920_v51 = vmul.f32 %v1223_v38, %v1625_v49  ;;  %v841_v62 = vadd.f32 1e-05, %v809_v28  ;;  %v742_v44 = vpop.xlane.xlu1 %741 }
 0x247   : > { %v787_v18 = vpop.xlane.xlu0 %786  ;;  %v995_v17 = vadd.f32 %v1721_v32, %v957_v39  ;;  %v901_v3 = vmul.f32 %v1225_v41, %v1639_v59  ;;  %1234 = vrsqrt.f32 %v844_v29  ;;  %v810_v47 = vmul.f32 0.0625, %v742_v44 }
 0x248   : > { %1012 = vst.msk [vmem:[%s1729_s10 + $0x58] sm:$0xff] %vm507_vm2, %v980_v43  ;;  %v958_v26 = vmul.f32 %v1715_v24, %v920_v51  ;;  %1236 = vrsqrt.f32 %v841_v62  ;;  %v825_v55 = vmul.f32 0.0625, %v787_v18 }
 0x249   : > { %v1227_v53 = vpop.eup %1226  ;;  %1027 = vst.msk [vmem:[%s1729_s10 + $0xd0] sm:$0xff] %vm507_vm2, %v995_v17  ;;  %v939_v49 = vmul.f32 %v1715_v24, %v901_v3  ;;  %v842_v54 = vadd.f32 1e-05, %v810_v47 }
 0x24a   : > { %v1229_v57 = vpop.eup %1228  ;;  %v996_v60 = vadd.f32 %v1721_v32, %v958_v26  ;;  %v902_v59 = vmul.f32 %v1227_v53, %v1636_v56  ;;  %v857_v58 = vadd.f32 1e-05, %v825_v55  ;;  %v790_v45 = vpop.xlane.xlu1 %789 }
 0x24b   : > { %v793_v63 = vpop.xlane.xlu0 %792  ;;  %v977_v50 = vadd.f32 %v1721_v32, %v939_v49  ;;  %v917_v22 = vmul.f32 %v1229_v57, %v1653_v30  ;;  %1238 = vrsqrt.f32 %v842_v54  ;;  %v826_v5 = vmul.f32 0.0625, %v790_v45 }
 0x24c   : > { %1028 = vst.msk [vmem:[%s1729_s10 + $0xd8] sm:$0xff] %vm507_vm2, %v996_v60  ;;  %v940_v7 = vmul.f32 %v1715_v24, %v902_v59  ;;  %1240 = vrsqrt.f32 %v857_v58  ;;  %v827_v11 = vmul.f32 0.0625, %v793_v63 }
 0x24d   : > { %v1231_v36 = vpop.eup %1230  ;;  %1009 = vst.msk [vmem:[%s1729_s10 + $0x40] sm:$0xff] %vm507_vm2, %v977_v50  ;;  %v955_v56 = vmul.f32 %v1715_v24, %v917_v22  ;;  %v858_v25 = vadd.f32 1e-05, %v826_v5 }
 0x24e   : > { %v1233_v16 = vpop.eup %1232  ;;  %v978_v19 = vadd.f32 %v1721_v32, %v940_v7  ;;  %v918_v30 = vmul.f32 %v1231_v36, %v1650_v27  ;;  %v859_v10 = vadd.f32 1e-05, %v827_v11  ;;  %v796_v1 = vpop.xlane.xlu1 %795 }
 0x24f   : > { %v993_v15 = vadd.f32 %v1721_v32, %v955_v56  ;;  %v907_v23 = vmul.f32 %v1233_v16, %v1664_v6  ;;  %1242 = vrsqrt.f32 %v858_v25  ;;  %v828_v0 = vmul.f32 0.0625, %v796_v1 }
 0x250   : > { %1010 = vst.msk [vmem:[%s1729_s10 + $0x48] sm:$0xff] %vm507_vm2, %v978_v19  ;;  %v956_v2 = vmul.f32 %v1715_v24, %v918_v30  ;;  %1244 = vrsqrt.f32 %v859_v10 }
 0x251   : > { %v1235_v35 = vpop.eup %1234  ;;  %1025 = vst.msk [vmem:[%s1729_s10 + $0xc0] sm:$0xff] %vm507_vm2, %v993_v15  ;;  %v945_v27 = vmul.f32 %v1715_v24, %v907_v23  ;;  %v860_v61 = vadd.f32 1e-05, %v828_v0 }
 0x252   : > { %v1237_v31 = vpop.eup %1236  ;;  %v994_v52 = vadd.f32 %v1721_v32, %v956_v2  ;;  %v908_v6 = vmul.f32 %v1235_v35, %v1661_v4 }
 0x253   : > { %v983_v14 = vadd.f32 %v1721_v32, %v945_v27  ;;  %v905_v34 = vmul.f32 %v1237_v31, %v1675_v9  ;;  %1246 = vrsqrt.f32 %v860_v61 }
 0x254   : > { %1026 = vst.msk [vmem:[%s1729_s10 + $0xc8] sm:$0xff] %vm507_vm2, %v994_v52  ;;  %v946_v33 = vmul.f32 %v1715_v24, %v908_v6 }
 0x255   : > { %v1239_v37 = vpop.eup %1238  ;;  %1015 = vst.msk [vmem:[%s1729_s10 + $0x70] sm:$0xff] %vm507_vm2, %v983_v14  ;;  %v943_v42 = vmul.f32 %v1715_v24, %v905_v34 }
 0x256   : > { %v1241_v48 = vpop.eup %1240  ;;  %v984_v46 = vadd.f32 %v1721_v32, %v946_v33  ;;  %v906_v4 = vmul.f32 %v1239_v37, %v1672_v8 }
 0x257   : > { %v981_v40 = vadd.f32 %v1721_v32, %v943_v42  ;;  %v921_v9 = vmul.f32 %v1241_v48, %v1689_v13 }
 0x258   : > { %1016 = vst.msk [vmem:[%s1729_s10 + $0x78] sm:$0xff] %vm507_vm2, %v984_v46  ;;  %v944_v28 = vmul.f32 %v1715_v24, %v906_v4 }
 0x259   : > { %v1243_v38 = vpop.eup %1242  ;;  %1013 = vst.msk [vmem:[%s1729_s10 + $0x60] sm:$0xff] %vm507_vm2, %v981_v40  ;;  %v959_v39 = vmul.f32 %v1715_v24, %v921_v9 }
 0x25a   : > { %v1245_v29 = vpop.eup %1244  ;;  %v982_v41 = vadd.f32 %v1721_v32, %v944_v28  ;;  %v922_v8 = vmul.f32 %v1243_v38, %v1686_v12 }
 0x25b   : > { %v997_v43 = vadd.f32 %v1721_v32, %v959_v39  ;;  %v923_v13 = vmul.f32 %v1245_v29, %v1700_v21 }
 0x25c   : > { %1014 = vst.msk [vmem:[%s1729_s10 + $0x68] sm:$0xff] %vm507_vm2, %v982_v41  ;;  %v960_v51 = vmul.f32 %v1715_v24, %v922_v8 }
 0x25d   : > { %v1247_v62 = vpop.eup %1246  ;;  %1029 = vst.msk [vmem:[%s1729_s10 + $0xe0] sm:$0xff] %vm507_vm2, %v997_v43  ;;  %v961_v44 = vmul.f32 %v1715_v24, %v923_v13 }
 0x25e   : > { %v998_v18 = vadd.f32 %v1721_v32, %v960_v51  ;;  %v924_v17 = vmul.f32 %v1247_v62, %v1697_v20 }
 0x25f   : > { %v999_v3 = vadd.f32 %v1721_v32, %v961_v44 }
 0x260   : > { %1030 = vst.msk [vmem:[%s1729_s10 + $0xe8] sm:$0xff] %vm507_vm2, %v998_v18  ;;  %v962_v12 = vmul.f32 %v1715_v24, %v924_v17 }
 0x261   : > { %1031 = vst.msk [vmem:[%s1729_s10 + $0xf0] sm:$0xff] %vm507_vm2, %v999_v3 }
 0x262   : > { %v1000_v21 = vadd.f32 %v1721_v32, %v962_v12 }
 0x264   : > { %1032 = vst.msk [vmem:[%s1729_s10 + $0xf8] sm:$0xff] %vm507_vm2, %v1000_v21 }
 0x265 PF: > { %s15_s18 = sadd.s32 1, %s1254_s18  }
 0x266   : > { %p12_p4 = scmp.ge.s32.totalorder %s15_s18, 4  }
 0x268   :  { %14 = sbr.rel (!%p12_p4) target bundleno = 1 (0x1), region = 70 }

</bundles_post_ra>
